<compile_context>
chip_gen: v5e
topology: v5e:2x2
jax: 0.10.0
libtpu: 0.0.40
codegen_flags: <defaults>
</compile_context>

<pallas_src>
import jax
import jax.numpy as jnp
from jax import lax
from jax.experimental import pallas as pl
from jax.experimental.pallas import tpu as pltpu


# ---------- packed-slab row layout (all section starts 8-aligned) ----------
ROW_W1 = 0      # rows   0:4    w1  (4, 128)   lanes 64:128 zero
ROW_B1 = 8      # row    8      b1  (1, 128)   lanes 64:128 zero
ROW_W2 = 16     # rows  16:144  w2  (128, 128) only [0:64, 0:64] nonzero
ROW_B2 = 144    # row  144      b2  (1, 128)   lanes 64:128 zero
ROW_WH = 152    # rows 152:280  fused head W (128, 128): lane0=+wdiff,
                #               lane1=-wdiff, lane2=wv, lanes 3:128 zero
ROW_BH = 280    # row  280      fused head bias (same lane layout)
SLAB_ROWS = 288  # padded to a multiple of 8


def mlp_kernel(x_ref, p_ref, out_ref):
    x = x_ref[...]                                      # (B, 4)

    w1 = p_ref[ROW_W1:ROW_W1 + 4, :]                    # (4, 128)
    b1 = p_ref[ROW_B1:ROW_B1 + 1, :]                    # (1, 128)
    w2 = p_ref[ROW_W2:ROW_W2 + 128, :]                  # (128, 128)
    b2 = p_ref[ROW_B2:ROW_B2 + 1, :]                    # (1, 128)
    wh = p_ref[ROW_WH:ROW_WH + 128, :]                  # (128, 128)
    bh = p_ref[ROW_BH:ROW_BH + 1, :]                    # (1, 128)

    # l1 + ReLU   (lanes 64:128 stay exactly 0: zero W columns + zero bias)
    h1 = jnp.maximum(
        jnp.dot(x, w1, preferred_element_type=jnp.float32) + b1, 0.0)
    # l2 + ReLU   (lanes 64:128 stay exactly 0)
    h2 = jnp.maximum(
        jnp.dot(h1, w2, preferred_element_type=jnp.float32) + b2, 0.0)
    # fused policy/value head -> (B, 128) lane-dense slab
    head = jnp.dot(h2, wh, preferred_element_type=jnp.float32) + bh

    # lanes 0,1 hold +-(l0 - l1): sigmoid gives the 2-class softmax directly.
    # lane 2 holds the value and is passed through untouched.
    sig = 1.0 / (1.0 + jnp.exp(-head))                  # EUP exp, VPU add/div
    lane = lax.broadcasted_iota(jnp.int32, head.shape, 1)
    out_ref[...] = jnp.where(lane < 2, sig, head).astype(out_ref.dtype)


def pack_params(w1, b1, w2, b2, wp, bp, wv, bv):
    """Pack PyTorch-style (in, out)/(1, out) params into one aligned slab."""
    slab = jnp.zeros((SLAB_ROWS, 128), jnp.float32)
    slab = slab.at[ROW_W1:ROW_W1 + 4, 0:64].set(w1)
    slab = slab.at[ROW_B1, 0:64].set(b1[0])
    slab = slab.at[ROW_W2:ROW_W2 + 64, 0:64].set(w2)
    slab = slab.at[ROW_B2, 0:64].set(b2[0])

    w_diff = wp[:, 0] - wp[:, 1]          # softmax(2) == sigmoid(l0 - l1)
    b_diff = bp[0, 0] - bp[0, 1]
    slab = slab.at[ROW_WH:ROW_WH + 64, 0].set(w_diff)
    slab = slab.at[ROW_WH:ROW_WH + 64, 1].set(-w_diff)
    slab = slab.at[ROW_WH:ROW_WH + 64, 2].set(wv[:, 0])
    slab = slab.at[ROW_BH, 0].set(b_diff)
    slab = slab.at[ROW_BH, 1].set(-b_diff)
    slab = slab.at[ROW_BH, 2].set(bv[0, 0])
    return slab


def cartpole_forward(x, param_slab):
    B = x.shape[0]
    vmem = pl.BlockSpec(memory_space=pltpu.MemorySpace.VMEM)
    out = pl.pallas_call(
        mlp_kernel,
        out_shape=jax.ShapeDtypeStruct((B, 128), jnp.float32),
        in_specs=[vmem, vmem],
        out_specs=vmem,
    )(x, param_slab)
    return out[:, 0:2], out[:, 2:3]


def init_linear(key, fan_in, fan_out):
    """Deterministic PyTorch-style uniform init, stored as (in, out) + (1, out)."""
    kw, kb = jax.random.split(key)
    bound = 1.0 / jnp.sqrt(jnp.float32(fan_in))
    w = jax.random.uniform(kw, (fan_in, fan_out), jnp.float32, -bound, bound)
    b = jax.random.uniform(kb, (1, fan_out), jnp.float32, -bound, bound)
    return w, b


def reference_forward(x, params):
    (w1, b1, w2, b2, wp, bp, wv, bv) = params
    h1 = jnp.maximum(x @ w1 + b1, 0.0)
    h2 = jnp.maximum(h1 @ w2 + b2, 0.0)
    p = h2 @ wp + bp
    v = h2 @ wv + bv
    return jax.nn.softmax(p, axis=-1), v


if __name__ == "__main__":
    key = jax.random.PRNGKey(0)
    k_x, k1, k2, kp, kv = jax.random.split(key, 5)

    B = 8  # batch of cartpole observations, each of dim 4
    x = jax.random.normal(k_x, (B, 4), jnp.float32)

    w1, b1 = init_linear(k1, 4, 64)
    w2, b2 = init_linear(k2, 64, 64)
    wp, bp = init_linear(kp, 64, 2)
    wv, bv = init_linear(kv, 64, 1)
    raw_params = (w1, b1, w2, b2, wp, bp, wv, bv)
    slab = pack_params(*raw_params)

    prob, v = cartpole_forward(x, slab)
    prob, v = jax.block_until_ready((prob, v))

    prob_ref, v_ref = reference_forward(x, raw_params)
    assert prob.shape == (B, 2) and v.shape == (B, 1)
    assert jnp.allclose(prob, prob_ref, atol=1e-5, rtol=1e-5)
    assert jnp.allclose(v, v_ref, atol=1e-5, rtol=1e-5)
    assert jnp.allclose(jnp.sum(prob, axis=-1), 1.0, atol=1e-5)

    print("KERNEL_OK")
</pallas_src>

<mosaic_0001>
module attributes {stable_mosaic.version = 11 : i64} {
  func.func @mlp_kernel(%arg0: memref<8x4xf32, #tpu.memory_space<vmem>>, %arg1: memref<288x128xf32, #tpu.memory_space<vmem>>, %arg2: memref<8x128xf32, #tpu.memory_space<vmem>>) attributes {dimension_semantics = [], scalar_prefetch = 0 : i64, scratch_operands = 0 : i64, tpu.core_type = #tpu.core_type<tc>} {
    %c0 = arith.constant 0 : index
    %c0_0 = arith.constant 0 : index
    %0 = vector.load %arg0[%c0, %c0_0] : memref<8x4xf32, #tpu.memory_space<vmem>>, vector<8x4xf32>
    %c0_1 = arith.constant 0 : index
    %c0_2 = arith.constant 0 : index
    %1 = vector.load %arg1[%c0_1, %c0_2] : memref<288x128xf32, #tpu.memory_space<vmem>>, vector<4x128xf32>
    %c8 = arith.constant 8 : index
    %c0_3 = arith.constant 0 : index
    %2 = vector.load %arg1[%c8, %c0_3] : memref<288x128xf32, #tpu.memory_space<vmem>>, vector<1x128xf32>
    %c16 = arith.constant 16 : index
    %c0_4 = arith.constant 0 : index
    %3 = vector.load %arg1[%c16, %c0_4] : memref<288x128xf32, #tpu.memory_space<vmem>>, vector<128x128xf32>
    %c144 = arith.constant 144 : index
    %c0_5 = arith.constant 0 : index
    %4 = vector.load %arg1[%c144, %c0_5] : memref<288x128xf32, #tpu.memory_space<vmem>>, vector<1x128xf32>
    %c152 = arith.constant 152 : index
    %c0_6 = arith.constant 0 : index
    %5 = vector.load %arg1[%c152, %c0_6] : memref<288x128xf32, #tpu.memory_space<vmem>>, vector<128x128xf32>
    %c280 = arith.constant 280 : index
    %c0_7 = arith.constant 0 : index
    %6 = vector.load %arg1[%c280, %c0_7] : memref<288x128xf32, #tpu.memory_space<vmem>>, vector<1x128xf32>
    %cst = arith.constant dense<0.000000e+00> : vector<8x128xf32>
    %7 = tpu.matmul %0, %1, %cst {dimension_numbers = #tpu.dot_dimension_numbers<[1], [0], [0], [1], [0, 0, 1, 1], [], []>} : vector<8x4xf32>, vector<4x128xf32>, vector<8x128xf32> -> vector<8x128xf32>
    %8 = vector.broadcast %2 : vector<1x128xf32> to vector<8x128xf32>
    %9 = arith.addf %7, %8 : vector<8x128xf32>
    %cst_8 = arith.constant 0.000000e+00 : f32
    %10 = vector.broadcast %cst_8 : f32 to vector<8x128xf32>
    %11 = arith.maximumf %9, %10 : vector<8x128xf32>
    %cst_9 = arith.constant dense<0.000000e+00> : vector<8x128xf32>
    %12 = tpu.matmul %11, %3, %cst_9 {dimension_numbers = #tpu.dot_dimension_numbers<[1], [0], [0], [1], [0, 0, 1, 1], [], []>} : vector<8x128xf32>, vector<128x128xf32>, vector<8x128xf32> -> vector<8x128xf32>
    %13 = vector.broadcast %4 : vector<1x128xf32> to vector<8x128xf32>
    %14 = arith.addf %12, %13 : vector<8x128xf32>
    %cst_10 = arith.constant 0.000000e+00 : f32
    %15 = vector.broadcast %cst_10 : f32 to vector<8x128xf32>
    %16 = arith.maximumf %14, %15 : vector<8x128xf32>
    %cst_11 = arith.constant dense<0.000000e+00> : vector<8x128xf32>
    %17 = tpu.matmul %16, %5, %cst_11 {dimension_numbers = #tpu.dot_dimension_numbers<[1], [0], [0], [1], [0, 0, 1, 1], [], []>} : vector<8x128xf32>, vector<128x128xf32>, vector<8x128xf32> -> vector<8x128xf32>
    %18 = vector.broadcast %6 : vector<1x128xf32> to vector<8x128xf32>
    %19 = arith.addf %17, %18 : vector<8x128xf32>
    %cst_12 = arith.constant 0.000000e+00 : f32
    %20 = vector.broadcast %cst_12 : f32 to vector<8x128xf32>
    %21 = arith.subf %20, %19 : vector<8x128xf32>
    %22 = math.exp %21 : vector<8x128xf32>
    %cst_13 = arith.constant 1.000000e+00 : f32
    %23 = vector.broadcast %cst_13 : f32 to vector<8x128xf32>
    %24 = arith.addf %23, %22 : vector<8x128xf32>
    %cst_14 = arith.constant 1.000000e+00 : f32
    %25 = vector.broadcast %cst_14 : f32 to vector<8x128xf32>
    %26 = arith.divf %25, %24 : vector<8x128xf32>
    %27 = tpu.iota {dimensions = array<i32: 1>} : vector<8x128xi32>
    %c2_i32 = arith.constant 2 : i32
    %28 = vector.broadcast %c2_i32 : i32 to vector<8x128xi32>
    %29 = arith.cmpi slt, %27, %28 : vector<8x128xi32>
    %30 = arith.select %29, %26, %19 : vector<8x128xi1>, vector<8x128xf32>
    %c0_15 = arith.constant 0 : index
    %c0_16 = arith.constant 0 : index
    %31 = vector.load %arg2[%c0_15, %c0_16] : memref<8x128xf32, #tpu.memory_space<vmem>>, vector<8x128xf32>
    tpu.vector_store %arg2[%c0_15, %c0_16], %30 {strides = array<i32>} : memref<8x128xf32, #tpu.memory_space<vmem>>, vector<8x128xf32>,
    return
  }
}

</mosaic_0001>

<bundles_post_ra>
// kernel: tpu_custom_call.1
= control target key start
LH: loop header
LB: loop body
LE: loop exit
PB: predicated region body
PF: predicated region fallthrough
CT: control target
= control target key end

     0   :  { %7 = vsyncpa [#allocation3], 0  ;;  %s272_s0 = inlined_call_operand.vmem [shape: f32[8,4], index: 0, kind: input, shape index: {}]   ;;  %s273_s1 = inlined_call_operand.hbm [shape: f32[288,128], index: 1, kind: input, shape index: {}]   ;;  %s274_s2 = inlined_call_operand.hbm [shape: f32[8,128], index: 2, kind: output, shape index: {}]  }
   0x1   :  { %8 = vsyncpa [#allocation4], 0  ;;  %s15_s11 = sshll.u32 %s273_s1, 4  ;;  %s244_s12 = smov [#allocation2]   ;;  %s16_s11 = int_to_ptr.hbm [resolvable:$true] %s15_s11 }
   0x2   :  { %s17_s13 = sshll.u32 %s244_s12, 4  ;;  %s245_s14 = smov 128   ;;  %s18_s13 = int_to_ptr.vmem [resolvable:$true] %s17_s13 }
   0x3   :  { %s246_s15 = smov 8  }
   0x4   :  { %23 = dma.hbm_to_vmem [thread:$0]  %s16_s11, 4608, %s18_s13, [#allocation3], %s245_s14, %s245_s14, %s246_s15  }
   0x5   :  { %240 = dma.done.wait [#allocation3], 4608  }
   0x6   :  { %241 = vsyncadd [#allocation3], 4294962688  ;;  %vm70_vm0 = vcmask 1043456   ;;  %vm66_vm1 = vcmask 31744   ;;  %v29_v0 = vld [vmem:[#allocation2] sm:$0xf]  ;;  %v157_v50 = vlaneseq }
   0x7   :  { %v28_v1 = vld [vmem:[%s272_s0] sm:$0xff]  ;;  %v46_v2 = vld [vmem:[#allocation2 + $0x88] sm:$0xff]  ;;  %179 = vmatpush.msk.msra.mxu0 %vm70_vm0, %v29_v0  ;;  %v44_v4 = vld [vmem:[#allocation2 + $0x78] sm:$0xff]  ;;  %s247_s0 = smov [#allocation5]   ;;  %s169_s20 = sshll.u32 %s274_s2, 4  ;;  %s170_s20 = int_to_ptr.hbm [resolvable:$true] %s169_s20 }
   0x8   :  { %96 = vmatpush.msra.mxu1 %v46_v2  ;;  %v45_v3 = vld [vmem:[#allocation2 + $0x80] sm:$0xff]  ;;  %180 = vmatmul.msk.f32.vlgmr.msra.gmra.mxu0 %vm66_vm1, %v28_v1  ;;  %v43_v5 = vld [vmem:[#allocation2 + $0x70] sm:$0xff]  ;;  %v42_v6 = vld [vmem:[#allocation2 + $0x68] sm:$0xff]  ;;  %v158_v54 = vand.u32 127, %v157_v50  ;;  %s167_s1 = sshll.u32 %s247_s0, 4  ;;  %s168_s1 = int_to_ptr.vmem [resolvable:$true] %s167_s1 }
   0x9   :  { %v41_v7 = vld [vmem:[#allocation2 + $0x60] sm:$0xff]  ;;  %v40_v8 = vld [vmem:[#allocation2 + $0x58] sm:$0xff]  ;;  %v39_v9 = vld [vmem:[#allocation2 + $0x50] sm:$0xff] }
   0xa   :  { %97 = vmatpush.msra.mxu1 %v45_v3  ;;  %v38_v10 = vld [vmem:[#allocation2 + $0x48] sm:$0xff]  ;;  %v37_v11 = vld [vmem:[#allocation2 + $0x40] sm:$0xff]  ;;  %v36_v12 = vld [vmem:[#allocation2 + $0x38] sm:$0xff]  ;;  %vm159_vm5 = vcmp.lt.s32.totalorder %v158_v54, 2 }
   0xb   :  { %v35_v13 = vld [vmem:[#allocation2 + $0x30] sm:$0xff]  ;;  %v34_v14 = vld [vmem:[#allocation2 + $0x28] sm:$0xff]  ;;  %v33_v15 = vld [vmem:[#allocation2 + $0x20] sm:$0xff] }
   0xc   :  { %98 = vmatpush.msra.mxu1 %v44_v4  ;;  %v32_v16 = vld [vmem:[#allocation2 + $0x18] sm:$0xff]  ;;  %v31_v17 = vld [vmem:[#allocation2 + $0x10] sm:$0xff]  ;;  %v62_v19 = vld [vmem:[#allocation2 + $0x108] sm:$0xff] }
   0xd   :  { %v63_v18 = vld [vmem:[#allocation2 + $0x110] sm:$0xff]  ;;  %v61_v20 = vld [vmem:[#allocation2 + $0x100] sm:$0xff]  ;;  %v60_v21 = vld [vmem:[#allocation2 + $0xf8] sm:$0xff] }
   0xe   :  { %99 = vmatpush.msra.mxu1 %v43_v5  ;;  %118 = vmatpush.msra.mxu2 %v63_v18  ;;  %v59_v22 = vld [vmem:[#allocation2 + $0xf0] sm:$0xff]  ;;  %v58_v23 = vld [vmem:[#allocation2 + $0xe8] sm:$0xff]  ;;  %v57_v24 = vld [vmem:[#allocation2 + $0xe0] sm:$0xff] }
   0xf   :  { %v56_v25 = vld [vmem:[#allocation2 + $0xd8] sm:$0xff]  ;;  %v55_v26 = vld [vmem:[#allocation2 + $0xd0] sm:$0xff]  ;;  %v54_v27 = vld [vmem:[#allocation2 + $0xc8] sm:$0xff] }
  0x10   :  { %100 = vmatpush.msra.mxu1 %v42_v6  ;;  %119 = vmatpush.msra.mxu2 %v62_v19  ;;  %v53_v28 = vld [vmem:[#allocation2 + $0xc0] sm:$0xff]  ;;  %v52_v29 = vld [vmem:[#allocation2 + $0xb8] sm:$0xff]  ;;  %v51_v30 = vld [vmem:[#allocation2 + $0xb0] sm:$0xff] }
  0x11   :  { %v185_v31 = vld [vmem:[#allocation2 + $0x8] ss:$0 sm:$0xff]  ;;  %v49_v36 = vld [vmem:[#allocation2 + $0xa0] sm:$0xff]  ;;  %v48_v37 = vld [vmem:[#allocation2 + $0x98] sm:$0xff] }
  0x12   :  { %101 = vmatpush.msra.mxu1 %v41_v7  ;;  %120 = vmatpush.msra.mxu2 %v61_v20  ;;  %v50_v35 = vld [vmem:[#allocation2 + $0xa8] sm:$0xff]  ;;  %v186_v38 = vld [vmem:[#allocation2 + $0x90] ss:$0 sm:$0xff]  ;;  %v187_v42 = vld [vmem:[#allocation2 + $0x118] ss:$0 sm:$0xff] }
  0x14   :  { %102 = vmatpush.msra.mxu1 %v40_v8  ;;  %121 = vmatpush.msra.mxu2 %v60_v21 }
  0x16   :  { %103 = vmatpush.msra.mxu1 %v39_v9  ;;  %122 = vmatpush.msra.mxu2 %v59_v22 }
  0x18   :  { %104 = vmatpush.msra.mxu1 %v38_v10  ;;  %123 = vmatpush.msra.mxu2 %v58_v23 }
  0x1a   :  { %105 = vmatpush.msra.mxu1 %v37_v11  ;;  %124 = vmatpush.msra.mxu2 %v57_v24 }
  0x1c   :  { %106 = vmatpush.msra.mxu1 %v36_v12  ;;  %125 = vmatpush.msra.mxu2 %v56_v25 }
  0x1e   :  { %107 = vmatpush.msra.mxu1 %v35_v13  ;;  %126 = vmatpush.msra.mxu2 %v55_v26 }
  0x20   :  { %108 = vmatpush.msra.mxu1 %v34_v14  ;;  %127 = vmatpush.msra.mxu2 %v54_v27 }
  0x22   :  { %109 = vmatpush.msra.mxu1 %v33_v15  ;;  %128 = vmatpush.msra.mxu2 %v53_v28 }
  0x24   :  { %110 = vmatpush.msra.mxu1 %v32_v16  ;;  %129 = vmatpush.msra.mxu2 %v52_v29 }
  0x26   :  { %111 = vmatpush.msra.mxu1 %v31_v17  ;;  %130 = vmatpush.msra.mxu2 %v51_v30 }
  0x28   :  { %131 = vmatpush.msra.mxu2 %v50_v35 }
  0x2a   :  { %132 = vmatpush.msra.mxu2 %v49_v36 }
  0x2c   :  { %133 = vmatpush.msra.mxu2 %v48_v37 }
  0x85   :  { %v91_v32 = vpop.f32.mrf.mxu0 }
  0x86   :  { %v92_v33 = vadd.f32 %v185_v31, %v91_v32 }
  0x88   :  { %v94_v34 = vmax.f32 %v92_v33, 0.0 }
  0x8a   :  { %112 = vmatmul.f32.vlgmr.msra.gmra.mxu1 %v94_v34 }
 0x107   :  { %v113_v39 = vpop.f32.mrf.mxu1 }
 0x108   :  { %v114_v40 = vadd.f32 %v186_v38, %v113_v39 }
 0x10a   :  { %v116_v41 = vmax.f32 %v114_v40, 0.0 }
 0x10c   :  { %134 = vmatmul.f32.vlgmr.msra.gmra.mxu2 %v116_v41 }
 0x18f   :  { %v135_v43 = vpop.f32.mrf.mxu2 }
 0x190   :  { %v136_v44 = vadd.f32 %v187_v42, %v135_v43 }
 0x192   :  { %v138_v45 = vsub.f32 0.0, %v136_v44 }
 0x194   :  { %v139_v46 = vmul.f32 1.442695, %v138_v45 }
 0x196   :  { %188 = vpow2.f32 %v139_v46 }
 0x19c   :  { %v189_v47 = vpop.eup %188 }
 0x19d   :  { %v141_v48 = vadd.f32 1.0, %v189_v47 }
 0x19f   :  { %190 = vrcp.f32 %v141_v48  ;;  %v153_v53 = vand.u32 2147483648, %v141_v48  ;;  %v151_v56 = vand.u32 2147483647, %v141_v48  ;;  %vm147_vm3 = vweird.f32 %v141_v48 }
 0x1a1   :  { %v154_v58 = vor.u32 1.1754944e-38, %v153_v53  ;;  %vm152_vm6 = vcmp.eq.f32.partialorder %v151_v56, 8.507059e+37 }
 0x1a5   :  { %v191_v49 = vpop.eup %190 }
 0x1a6   :  { %v143_v51 = vmul.f32 %v191_v49, %v141_v48  ;;  %vm148_vm2 = vweird.f32 %v191_v49 }
 0x1a7   :  { %vm149_vm4 = vmor %vm147_vm3, %vm148_vm2 }
 0x1a8   :  { %v144_v52 = vsub.f32 1.0, %v143_v51 }
 0x1aa   :  { %v145_v55 = vmul.f32 %v191_v49, %v144_v52 }
 0x1ac   :  { %v146_v57 = vadd.f32 %v191_v49, %v145_v55 }
 0x1ae   :  { %v150_v59 = vsel %vm149_vm4, %v191_v49, %v146_v57 }
 0x1af   :  { %v155_v60 = vsel %vm152_vm6, %v154_v58, %v150_v59 }
 0x1b0   :  { %v160_v61 = vsel %vm159_vm5, %v155_v60, %v136_v44 }
 0x1b1   :  { %161 = vst [vmem:[#allocation5] sm:$0xff] %v160_v61 }
 0x1b2   :  { %172 = dma.vmem_to_hbm [thread:$0]  %s168_s1, 128, %s170_s20, [#allocation4]  }
 0x1b3   :  { %242 = dma.done.wait [#allocation4], 128  }
 0x1b4   :  { %243 = vsyncadd [#allocation4], 4294967168 }
 0x1b5   :  { %177 = vsyncpa [#allocation3], 1 }
 0x1b6   :  { %178 = vsyncpa [#allocation4], 1 }

</bundles_post_ra>
